<compile_context>
chip_gen: v7x
topology: tpu7x:2x2x1
jax: 0.10.0
libtpu: 0.0.40
codegen_flags: <defaults>
</compile_context>

<pallas_src>
import functools

import jax
import jax.numpy as jnp
from jax import lax
from jax.experimental import pallas as pl
from jax.experimental.pallas import tpu as pltpu

_SQRT_2_OVER_PI = 0.7978845608028654


def _gelu_tanh(x):
    # tanh-approximate GELU: the transcendental rides the EUP slot instead of
    # a long VALU rational-erf expansion.  |err| vs exact erf-GELU ~3e-4.
    # TODO(synk): torch default is exact erf GELU; deviation is well inside the
    # test tolerance but flagged here.
    return 0.5 * x * (1.0 + jnp.tanh(_SQRT_2_OVER_PI * (x + 0.044715 * x * x * x)))


# ----------------------------------------------------------------------------
# Fused encoder kernel: every ConvBlock, one batch element per grid step.
# ----------------------------------------------------------------------------
def _encoder_kernel(meta, L, LP, x_ref, *refs):
    """meta: tuple of (c_in, c_out, K, dilation, pad) per ConvBlock."""
    stack_ref = refs[-1]            # f32 VMEM scratch (rows_max, LP) for the tap stack
    o_ref = refs[-2]
    w_refs = refs[:-2]

    def write_taps(g, c, K, d, pad):
        # stack[j*c + ci, t] = g[ci, t + j*d - pad]; zero when the source column
        # falls outside [0, L)  (== conv1d zero "same" padding).  Static slices
        # only; every written element is written exactly once (no full-buffer
        # zero fill), and no column >= L of g is ever read.
        for j in range(K):
            s = j * d - pad
            lo = max(0, -s)                  # first output col with a valid source
            src_lo = max(0, s)
            src_hi = min(L, LP + s)
            n = src_hi - src_lo
            assert n > 0, "tile too short for this dilation"
            r0 = j * c
            if lo > 0:
                stack_ref[r0:r0 + c, 0:lo] = jnp.zeros((c, lo), jnp.float32)
            stack_ref[r0:r0 + c, lo:lo + n] = g[:, src_lo:src_hi]
            if lo + n < LP:
                stack_ref[r0:r0 + c, lo + n:LP] = jnp.zeros((c, LP - lo - n), jnp.float32)

    x = x_ref[0].astype(jnp.float32)         # (C0, LP); cols >= L are zero-padded.
    # NOTE: columns >= L may hold junk after the first block (bias of the 1x1
    # projector etc.).  That is harmless: the tap builder never reads source
    # columns >= L, and the wrapper slices the output back to [:, :, :L].

    for bi, (c_in, c_out, K, d, pad) in enumerate(meta):
        w1 = w_refs[4 * bi + 0][...]         # bf16 (c_out, K*c_in)         = f * (w_cal * W_conv)
        b1 = w_refs[4 * bi + 1][...]         # f32  (c_out, 1)              = f * (bias * b_cal)
        w2 = w_refs[4 * bi + 2][...]         # bf16 (c_out, K*c_out + c_in) = [f*conv2 | projector]
        b2 = w_refs[4 * bi + 3][...]         # f32  (c_out, 1)              = f*bias2 + proj_bias

        # SamePadConv #1: single fused MXU dot over the K-tap stack of gelu(x).
        write_taps(_gelu_tanh(x), c_in, K, d, pad)
        y = jnp.dot(w1, stack_ref[0:K * c_in, :].astype(jnp.bfloat16),
                    preferred_element_type=jnp.float32) + b1

        # SamePadConv #2 with the residual 1x1 projector folded in as C_in
        # extra contraction rows carrying the raw block input.
        write_taps(_gelu_tanh(y), c_out, K, d, pad)
        stack_ref[K * c_out:K * c_out + c_in, :] = x
        x = jnp.dot(w2, stack_ref[0:K * c_out + c_in, :].astype(jnp.bfloat16),
                    preferred_element_type=jnp.float32) + b2

    o_ref[0] = x.astype(o_ref.dtype)


def dilated_conv_encoder(x, blocks):
    """Whole DilatedConvEncoder forward as a single fused Pallas call."""
    B, C0, L = x.shape
    LP = ((L + 127) // 128) * 128            # lane-dense last dim (multiple of 128)
    if LP != L:
        x = jnp.pad(x, ((0, 0), (0, 0), (0, LP - L)))

    meta = tuple((int(b["c_in"]), int(b["c_out"]), int(b["k"]),
                  int(b["dilation"]), int(b["pad"])) for b in blocks)
    c_last = meta[-1][1]
    rows_max = max(max(K * ci, K * co + ci) for ci, co, K, d, p in meta)
    rows_max = ((rows_max + 7) // 8) * 8

    weight_args = []
    in_specs = [pl.BlockSpec((1, C0, LP), lambda b: (b, 0, 0))]
    for blk in blocks:
        for name in ("w1", "b1", "w2", "b2"):
            arr = blk[name]
            weight_args.append(arr)
            in_specs.append(pl.BlockSpec(arr.shape, lambda b, _nd=arr.ndim: (0,) * _nd))

    # VMEM budget: double-buffered activation I/O blocks + weights + tap-stack
    # scratch + headroom for register-spilled intermediates (~50% margin).
    weight_bytes = sum(int(a.size) * a.dtype.itemsize for a in weight_args)
    act_bytes = 2 * 4 * LP * (C0 + c_last)
    scratch_bytes = 4 * rows_max * LP
    live_bytes = 4 * LP * sum(3 * ci + 4 * co for ci, co, K, d, p in meta)
    vmem_bytes = int(1.5 * (act_bytes + 2 * weight_bytes + scratch_bytes + live_bytes))
    vmem_bytes = max(8 << 20, min(vmem_bytes, 64 << 20))

    out = pl.pallas_call(
        functools.partial(_encoder_kernel, meta, L, LP),
        out_shape=jax.ShapeDtypeStruct((B, c_last, LP), x.dtype),
        grid=(B,),
        in_specs=in_specs,
        out_specs=pl.BlockSpec((1, c_last, LP), lambda b: (b, 0, 0)),
        scratch_shapes=[pltpu.VMEM((rows_max, LP), jnp.float32)],
        compiler_params=pltpu.CompilerParams(
            dimension_semantics=("parallel",),
            vmem_limit_bytes=vmem_bytes),
    )(x, *weight_args)
    # TODO(synk): for very long sequences / many channels (v7x's 64 MiB VMEM),
    # add an L-tile grid axis with a receptive-field halo instead of keeping
    # the full padded sequence resident per batch element.
    return out[:, :, :L]


# ----------------------------------------------------------------------------
# Parameter init + FSNet calibration glue (plain JAX, x-independent)
# ----------------------------------------------------------------------------
def _uniform(key, shape, scale=0.2):
    return jax.random.uniform(key, shape, jnp.float32, -scale, scale)


def init_same_pad_conv(key, c_in, c_out, k):
    assert c_out % c_in == 0
    nh = 64
    ratio = c_out // c_in
    ks = jax.random.split(key, 9)
    return dict(
        conv_w=_uniform(ks[0], (c_out, c_in, k)),
        bias=jnp.zeros((c_out,), jnp.float32),          # torch init: zeros
        ctrl_w=_uniform(ks[1], (nh, c_out * k)),        # controller Linear
        ctrl_b=_uniform(ks[2], (nh,)),
        calw_w=_uniform(ks[3], (k, nh)),                # calib_w
        calw_b=_uniform(ks[4], (k,)),
        calb_w=_uniform(ks[5], (ratio, nh)),            # calib_b
        calb_b=_uniform(ks[6], (ratio,)),
        calf_w=_uniform(ks[7], (ratio, nh)),            # calib_f
        calf_b=_uniform(ks[8], (ratio,)),
    )


def fw_chunks(p, c_in, c_out, k):
    # SamePadConv.fw_chunks at the module's initial state:
    #   grads == 0, trigger == 0, first call (q_ema branch does not modify q).
    # TODO(synk): store_grad / q_ema EMA / top-k W-dictionary update is
    # training-time state machinery not executed by this forward pass.
    g = jnp.zeros((c_in, c_out * k), jnp.float32)                # self.grads
    rep = jax.nn.silu(g @ p["ctrl_w"].T + p["ctrl_b"])           # (c_in, 64)
    w = rep @ p["calw_w"].T + p["calw_b"]                        # (c_in, k)
    b = rep @ p["calb_w"].T + p["calb_b"]                        # (c_in, c_out//c_in)
    f = rep @ p["calf_w"].T + p["calf_b"]                        # (c_in, c_out//c_in)
    cw = p["conv_w"] * w[None, :, :]                             # (c_out, c_in, k)
    eff_bias = p["bias"] * b.reshape(-1)                         # (c_out,)
    f_scale = f.reshape(-1)                                      # (c_out,)
    return (jnp.transpose(cw, (2, 0, 1)),                        # (k, c_out, c_in)
            eff_bias.reshape(c_out, 1),
            f_scale.reshape(c_out, 1))


def init_encoder(key, in_channels, channels, kernel_size):
    blocks = []
    c_prev = in_channels
    keys = jax.random.split(key, len(channels))
    for i, c_out in enumerate(channels):
        final = (i == len(channels) - 1)
        dilation = 2 ** i
        rf = (kernel_size - 1) * dilation + 1
        # torch's SamePadConv.forward never crops, so the residual add only
        # type-checks when the receptive field is odd (true for K=3).
        assert rf % 2 == 1, "even receptive field not supported by this forward"
        pad = rf // 2
        bkeys = jax.random.split(keys[i], 4)
        p1 = init_same_pad_conv(bkeys[0], c_prev, c_out, kernel_size)
        p2 = init_same_pad_conv(bkeys[1], c_out, c_out, kernel_size)
        if c_prev != c_out or final:
            wp = _uniform(bkeys[2], (c_out, c_prev))
            bp = _uniform(bkeys[3], (c_out,))
        else:  # projector is None -> identity residual
            wp = jnp.eye(c_out, dtype=jnp.float32)
            bp = jnp.zeros((c_out,), jnp.float32)
        cw1, eb1, f1 = fw_chunks(p1, c_prev, c_out, kernel_size)   # (k,co,ci),(co,1),(co,1)
        cw2, eb2, f2 = fw_chunks(p2, c_out, c_out, kernel_size)
        bp2 = bp.reshape(c_out, 1)

        # Fused kernel parameters: fold f into weight+bias, flatten taps along
        # the contraction dim, append the residual projector to conv2's weight.
        w1 = (f1[None] * cw1).transpose(1, 0, 2).reshape(c_out, kernel_size * c_prev)
        b1 = f1 * eb1
        w2_conv = (f2[None] * cw2).transpose(1, 0, 2).reshape(c_out, kernel_size * c_out)
        w2 = jnp.concatenate([w2_conv, wp], axis=1)
        b2 = f2 * eb2 + bp2

        blocks.append(dict(
            c_in=c_prev, c_out=c_out, k=kernel_size, dilation=dilation, pad=pad,
            # exact f32 params (for the reference)
            cw1=cw1, eb1=eb1, f1=f1, cw2=cw2, eb2=eb2, f2=f2, wp=wp, bp=bp2,
            # fused kernel params (matmul operands kept in bf16)
            w1=w1.astype(jnp.bfloat16), b1=b1,
            w2=w2.astype(jnp.bfloat16), b2=b2))
        c_prev = c_out
    return blocks


# ----------------------------------------------------------------------------
# Pure-JAX f32 reference (exact erf GELU, torch semantics) for a sanity check
# ----------------------------------------------------------------------------
def _ref_block(x, blk):
    B, _, L = x.shape
    K, C_out, _ = blk["cw1"].shape
    d = blk["dilation"]
    pad = blk["pad"]

    def dconv(h, taps):
        hp = jnp.pad(h, ((0, 0), (0, 0), (pad, pad)))
        acc = jnp.zeros((B, C_out, L), jnp.float32)
        for j in range(K):
            acc = acc + jnp.einsum("oi,bil->bol", taps[j],
                                   hp[:, :, j * d:j * d + L],
                                   precision=lax.Precision.HIGHEST)
        return acc

    gelu = lambda v: jax.nn.gelu(v, approximate=False)
    res = jnp.einsum("oi,bil->bol", blk["wp"], x,
                     precision=lax.Precision.HIGHEST) + blk["bp"][None]
    y = (dconv(gelu(x), blk["cw1"]) + blk["eb1"][None]) * blk["f1"][None]
    y2 = (dconv(gelu(y), blk["cw2"]) + blk["eb2"][None]) * blk["f2"][None]
    return y2 + res


if __name__ == "__main__":
    key = jax.random.PRNGKey(0)
    B, C_in, L = 2, 8, 16
    channels = [8, 8]
    kernel_size = 3

    kx, kp = jax.random.split(key)
    x = jax.random.normal(kx, (B, C_in, L), jnp.float32)
    blocks = init_encoder(kp, C_in, channels, kernel_size)

    out = dilated_conv_encoder(x, blocks)
    out = jax.block_until_ready(out)

    ref = x
    for blk in blocks:
        ref = _ref_block(ref, blk)

    assert out.shape == (B, channels[-1], L)
    # 3e-2 tolerance: kernel uses bf16 matmul operands + tanh GELU vs the exact
    # f32 erf-GELU reference (observed error is ~1e-2 worst case).
    assert jnp.allclose(out, ref, atol=3e-2, rtol=3e-2), \
        float(jnp.max(jnp.abs(out - ref)))
    print("KERNEL_OK")
</pallas_src>

<mosaic_0001>
module attributes {stable_mosaic.version = 11 : i64} {
  func.func @_encoder_kernel(%arg0: i32, %arg1: memref<1x8x128xf32, #tpu.memory_space<vmem>>, %arg2: memref<8x24xbf16, #tpu.memory_space<vmem>>, %arg3: memref<8x1xf32, #tpu.memory_space<vmem>>, %arg4: memref<8x32xbf16, #tpu.memory_space<vmem>>, %arg5: memref<8x1xf32, #tpu.memory_space<vmem>>, %arg6: memref<8x24xbf16, #tpu.memory_space<vmem>>, %arg7: memref<8x1xf32, #tpu.memory_space<vmem>>, %arg8: memref<8x32xbf16, #tpu.memory_space<vmem>>, %arg9: memref<8x1xf32, #tpu.memory_space<vmem>>, %arg10: memref<1x8x128xf32, #tpu.memory_space<vmem>>, %arg11: memref<32x128xf32, #tpu.memory_space<vmem>>) attributes {dimension_semantics = [#tpu.dimension_semantics<parallel>], iteration_bounds = array<i64: 2>, scalar_prefetch = 0 : i64, scratch_operands = 1 : i64, tpu.core_type = #tpu.core_type<tc>, window_params = [{transform_indices = @transform_0, window_bounds = array<i64: 1, 8, 128>}, {pipeline_mode = #tpu.pipeline_mode<synchronous>, transform_indices = @transform_1, window_bounds = array<i64: 8, 24>}, {pipeline_mode = #tpu.pipeline_mode<synchronous>, transform_indices = @transform_2, window_bounds = array<i64: 8, 1>}, {pipeline_mode = #tpu.pipeline_mode<synchronous>, transform_indices = @transform_3, window_bounds = array<i64: 8, 32>}, {pipeline_mode = #tpu.pipeline_mode<synchronous>, transform_indices = @transform_4, window_bounds = array<i64: 8, 1>}, {pipeline_mode = #tpu.pipeline_mode<synchronous>, transform_indices = @transform_5, window_bounds = array<i64: 8, 24>}, {pipeline_mode = #tpu.pipeline_mode<synchronous>, transform_indices = @transform_6, window_bounds = array<i64: 8, 1>}, {pipeline_mode = #tpu.pipeline_mode<synchronous>, transform_indices = @transform_7, window_bounds = array<i64: 8, 32>}, {pipeline_mode = #tpu.pipeline_mode<synchronous>, transform_indices = @transform_8, window_bounds = array<i64: 8, 1>}, {transform_indices = @transform_9, window_bounds = array<i64: 1, 8, 128>}]} {
    %c0 = arith.constant 0 : index
    %c0_0 = arith.constant 0 : index
    %c0_1 = arith.constant 0 : index
    %0 = vector.load %arg1[%c0, %c0_0, %c0_1] : memref<1x8x128xf32, #tpu.memory_space<vmem>>, vector<1x8x128xf32>
    %1 = vector.shape_cast %0 : vector<1x8x128xf32> to vector<8x128xf32>
    %c0_2 = arith.constant 0 : index
    %c0_3 = arith.constant 0 : index
    %2 = vector.load %arg2[%c0_2, %c0_3] : memref<8x24xbf16, #tpu.memory_space<vmem>>, vector<8x24xbf16>
    %c0_4 = arith.constant 0 : index
    %c0_5 = arith.constant 0 : index
    %3 = vector.load %arg3[%c0_4, %c0_5] : memref<8x1xf32, #tpu.memory_space<vmem>>, vector<8x1xf32>
    %c0_6 = arith.constant 0 : index
    %c0_7 = arith.constant 0 : index
    %4 = vector.load %arg4[%c0_6, %c0_7] : memref<8x32xbf16, #tpu.memory_space<vmem>>, vector<8x32xbf16>
    %c0_8 = arith.constant 0 : index
    %c0_9 = arith.constant 0 : index
    %5 = vector.load %arg5[%c0_8, %c0_9] : memref<8x1xf32, #tpu.memory_space<vmem>>, vector<8x1xf32>
    %cst = arith.constant 5.000000e-01 : f32
    %6 = vector.broadcast %cst : f32 to vector<8x128xf32>
    %7 = arith.mulf %6, %1 : vector<8x128xf32>
    %cst_10 = arith.constant 4.471500e-02 : f32
    %8 = vector.broadcast %cst_10 : f32 to vector<8x128xf32>
    %9 = arith.mulf %8, %1 : vector<8x128xf32>
    %10 = arith.mulf %9, %1 : vector<8x128xf32>
    %11 = arith.mulf %10, %1 : vector<8x128xf32>
    %12 = arith.addf %1, %11 : vector<8x128xf32>
    %cst_11 = arith.constant 0.797884583 : f32
    %13 = vector.broadcast %cst_11 : f32 to vector<8x128xf32>
    %14 = arith.mulf %13, %12 : vector<8x128xf32>
    %15 = math.tanh %14 : vector<8x128xf32>
    %cst_12 = arith.constant 1.000000e+00 : f32
    %16 = vector.broadcast %cst_12 : f32 to vector<8x128xf32>
    %17 = arith.addf %16, %15 : vector<8x128xf32>
    %18 = arith.mulf %7, %17 : vector<8x128xf32>
    %cst_13 = arith.constant 0.000000e+00 : f32
    %19 = vector.broadcast %cst_13 : f32 to vector<8x1xf32>
    %c0_14 = arith.constant 0 : index
    %c0_15 = arith.constant 0 : index
    %20 = vector.load %arg11[%c0_14, %c0_15] : memref<32x128xf32, #tpu.memory_space<vmem>>, vector<8x1xf32>
    tpu.vector_store %arg11[%c0_14, %c0_15], %19 {strides = array<i32>} : memref<32x128xf32, #tpu.memory_space<vmem>>, vector<8x1xf32>,
    %21 = vector.extract_strided_slice %18 {offsets = [0, 0], sizes = [8, 16], strides = [1, 1]} : vector<8x128xf32> to vector<8x16xf32>
    %c0_16 = arith.constant 0 : index
    %c1 = arith.constant 1 : index
    %22 = vector.load %arg11[%c0_16, %c1] : memref<32x128xf32, #tpu.memory_space<vmem>>, vector<8x16xf32>
    tpu.vector_store %arg11[%c0_16, %c1], %21 {strides = array<i32>} : memref<32x128xf32, #tpu.memory_space<vmem>>, vector<8x16xf32>,
    %cst_17 = arith.constant 0.000000e+00 : f32
    %23 = vector.broadcast %cst_17 : f32 to vector<8x111xf32>
    %c0_18 = arith.constant 0 : index
    %c17 = arith.constant 17 : index
    %24 = vector.load %arg11[%c0_18, %c17] : memref<32x128xf32, #tpu.memory_space<vmem>>, vector<8x111xf32>
    tpu.vector_store %arg11[%c0_18, %c17], %23 {strides = array<i32>} : memref<32x128xf32, #tpu.memory_space<vmem>>, vector<8x111xf32>,
    %25 = vector.extract_strided_slice %18 {offsets = [0, 0], sizes = [8, 16], strides = [1, 1]} : vector<8x128xf32> to vector<8x16xf32>
    %c8 = arith.constant 8 : index
    %c0_19 = arith.constant 0 : index
    %26 = vector.load %arg11[%c8, %c0_19] : memref<32x128xf32, #tpu.memory_space<vmem>>, vector<8x16xf32>
    tpu.vector_store %arg11[%c8, %c0_19], %25 {strides = array<i32>} : memref<32x128xf32, #tpu.memory_space<vmem>>, vector<8x16xf32>,
    %cst_20 = arith.constant 0.000000e+00 : f32
    %27 = vector.broadcast %cst_20 : f32 to vector<8x112xf32>
    %c8_21 = arith.constant 8 : index
    %c16 = arith.constant 16 : index
    %28 = vector.load %arg11[%c8_21, %c16] : memref<32x128xf32, #tpu.memory_space<vmem>>, vector<8x112xf32>
    tpu.vector_store %arg11[%c8_21, %c16], %27 {strides = array<i32>} : memref<32x128xf32, #tpu.memory_space<vmem>>, vector<8x112xf32>,
    %29 = vector.extract_strided_slice %18 {offsets = [0, 1], sizes = [8, 15], strides = [1, 1]} : vector<8x128xf32> to vector<8x15xf32>
    %c16_22 = arith.constant 16 : index
    %c0_23 = arith.constant 0 : index
    %30 = vector.load %arg11[%c16_22, %c0_23] : memref<32x128xf32, #tpu.memory_space<vmem>>, vector<8x15xf32>
    tpu.vector_store %arg11[%c16_22, %c0_23], %29 {strides = array<i32>} : memref<32x128xf32, #tpu.memory_space<vmem>>, vector<8x15xf32>,
    %cst_24 = arith.constant 0.000000e+00 : f32
    %31 = vector.broadcast %cst_24 : f32 to vector<8x113xf32>
    %c16_25 = arith.constant 16 : index
    %c15 = arith.constant 15 : index
    %32 = vector.load %arg11[%c16_25, %c15] : memref<32x128xf32, #tpu.memory_space<vmem>>, vector<8x113xf32>
    tpu.vector_store %arg11[%c16_25, %c15], %31 {strides = array<i32>} : memref<32x128xf32, #tpu.memory_space<vmem>>, vector<8x113xf32>,
    %c0_26 = arith.constant 0 : index
    %c0_27 = arith.constant 0 : index
    %33 = vector.load %arg11[%c0_26, %c0_27] : memref<32x128xf32, #tpu.memory_space<vmem>>, vector<24x128xf32>
    %34 = arith.truncf %33 : vector<24x128xf32> to vector<24x128xbf16>
    %cst_28 = arith.constant dense<0.000000e+00> : vector<8x128xf32>
    %35 = tpu.matmul %2, %34, %cst_28 {dimension_numbers = #tpu.dot_dimension_numbers<[1], [0], [0], [1], [0, 0, 1, 1], [], []>} : vector<8x24xbf16>, vector<24x128xbf16>, vector<8x128xf32> -> vector<8x128xf32>
    %36 = vector.broadcast %3 : vector<8x1xf32> to vector<8x128xf32>
    %37 = arith.addf %35, %36 : vector<8x128xf32>
    %cst_29 = arith.constant 5.000000e-01 : f32
    %38 = vector.broadcast %cst_29 : f32 to vector<8x128xf32>
    %39 = arith.mulf %38, %37 : vector<8x128xf32>
    %cst_30 = arith.constant 4.471500e-02 : f32
    %40 = vector.broadcast %cst_30 : f32 to vector<8x128xf32>
    %41 = arith.mulf %40, %37 : vector<8x128xf32>
    %42 = arith.mulf %41, %37 : vector<8x128xf32>
    %43 = arith.mulf %42, %37 : vector<8x128xf32>
    %44 = arith.addf %37, %43 : vector<8x128xf32>
    %cst_31 = arith.constant 0.797884583 : f32
    %45 = vector.broadcast %cst_31 : f32 to vector<8x128xf32>
    %46 = arith.mulf %45, %44 : vector<8x128xf32>
    %47 = math.tanh %46 : vector<8x128xf32>
    %cst_32 = arith.constant 1.000000e+00 : f32
    %48 = vector.broadcast %cst_32 : f32 to vector<8x128xf32>
    %49 = arith.addf %48, %47 : vector<8x128xf32>
    %50 = arith.mulf %39, %49 : vector<8x128xf32>
    %cst_33 = arith.constant 0.000000e+00 : f32
    %51 = vector.broadcast %cst_33 : f32 to vector<8x1xf32>
    %c0_34 = arith.constant 0 : index
    %c0_35 = arith.constant 0 : index
    %52 = vector.load %arg11[%c0_34, %c0_35] : memref<32x128xf32, #tpu.memory_space<vmem>>, vector<8x1xf32>
    tpu.vector_store %arg11[%c0_34, %c0_35], %51 {strides = array<i32>} : memref<32x128xf32, #tpu.memory_space<vmem>>, vector<8x1xf32>,
    %53 = vector.extract_strided_slice %50 {offsets = [0, 0], sizes = [8, 16], strides = [1, 1]} : vector<8x128xf32> to vector<8x16xf32>
    %c0_36 = arith.constant 0 : index
    %c1_37 = arith.constant 1 : index
    %54 = vector.load %arg11[%c0_36, %c1_37] : memref<32x128xf32, #tpu.memory_space<vmem>>, vector<8x16xf32>
    tpu.vector_store %arg11[%c0_36, %c1_37], %53 {strides = array<i32>} : memref<32x128xf32, #tpu.memory_space<vmem>>, vector<8x16xf32>,
    %cst_38 = arith.constant 0.000000e+00 : f32
    %55 = vector.broadcast %cst_38 : f32 to vector<8x111xf32>
    %c0_39 = arith.constant 0 : index
    %c17_40 = arith.constant 17 : index
    %56 = vector.load %arg11[%c0_39, %c17_40] : memref<32x128xf32, #tpu.memory_space<vmem>>, vector<8x111xf32>
    tpu.vector_store %arg11[%c0_39, %c17_40], %55 {strides = array<i32>} : memref<32x128xf32, #tpu.memory_space<vmem>>, vector<8x111xf32>,
    %57 = vector.extract_strided_slice %50 {offsets = [0, 0], sizes = [8, 16], strides = [1, 1]} : vector<8x128xf32> to vector<8x16xf32>
    %c8_41 = arith.constant 8 : index
    %c0_42 = arith.constant 0 : index
    %58 = vector.load %arg11[%c8_41, %c0_42] : memref<32x128xf32, #tpu.memory_space<vmem>>, vector<8x16xf32>
    tpu.vector_store %arg11[%c8_41, %c0_42], %57 {strides = array<i32>} : memref<32x128xf32, #tpu.memory_space<vmem>>, vector<8x16xf32>,
    %cst_43 = arith.constant 0.000000e+00 : f32
    %59 = vector.broadcast %cst_43 : f32 to vector<8x112xf32>
    %c8_44 = arith.constant 8 : index
    %c16_45 = arith.constant 16 : index
    %60 = vector.load %arg11[%c8_44, %c16_45] : memref<32x128xf32, #tpu.memory_space<vmem>>, vector<8x112xf32>
    tpu.vector_store %arg11[%c8_44, %c16_45], %59 {strides = array<i32>} : memref<32x128xf32, #tpu.memory_space<vmem>>, vector<8x112xf32>,
    %61 = vector.extract_strided_slice %50 {offsets = [0, 1], sizes = [8, 15], strides = [1, 1]} : vector<8x128xf32> to vector<8x15xf32>
    %c16_46 = arith.constant 16 : index
    %c0_47 = arith.constant 0 : index
    %62 = vector.load %arg11[%c16_46, %c0_47] : memref<32x128xf32, #tpu.memory_space<vmem>>, vector<8x15xf32>
    tpu.vector_store %arg11[%c16_46, %c0_47], %61 {strides = array<i32>} : memref<32x128xf32, #tpu.memory_space<vmem>>, vector<8x15xf32>,
    %cst_48 = arith.constant 0.000000e+00 : f32
    %63 = vector.broadcast %cst_48 : f32 to vector<8x113xf32>
    %c16_49 = arith.constant 16 : index
    %c15_50 = arith.constant 15 : index
    %64 = vector.load %arg11[%c16_49, %c15_50] : memref<32x128xf32, #tpu.memory_space<vmem>>, vector<8x113xf32>
    tpu.vector_store %arg11[%c16_49, %c15_50], %63 {strides = array<i32>} : memref<32x128xf32, #tpu.memory_space<vmem>>, vector<8x113xf32>,
    %c24 = arith.constant 24 : index
    %c0_51 = arith.constant 0 : index
    %65 = vector.load %arg11[%c24, %c0_51] : memref<32x128xf32, #tpu.memory_space<vmem>>, vector<8x128xf32>
    tpu.vector_store %arg11[%c24, %c0_51], %1 {strides = array<i32>} : memref<32x128xf32, #tpu.memory_space<vmem>>, vector<8x128xf32>,
    %c0_52 = arith.constant 0 : index
    %c0_53 = arith.constant 0 : index
    %66 = vector.load %arg11[%c0_52, %c0_53] : memref<32x128xf32, #tpu.memory_space<vmem>>, vector<32x128xf32>
    %67 = arith.truncf %66 : vector<32x128xf32> to vector<32x128xbf16>
    %cst_54 = arith.constant dense<0.000000e+00> : vector<8x128xf32>
    %68 = tpu.matmul %4, %67, %cst_54 {dimension_numbers = #tpu.dot_dimension_numbers<[1], [0], [0], [1], [0, 0, 1, 1], [], []>} : vector<8x32xbf16>, vector<32x128xbf16>, vector<8x128xf32> -> vector<8x128xf32>
    %69 = vector.broadcast %5 : vector<8x1xf32> to vector<8x128xf32>
    %70 = arith.addf %68, %69 : vector<8x128xf32>
    %c0_55 = arith.constant 0 : index
    %c0_56 = arith.constant 0 : index
    %71 = vector.load %arg6[%c0_55, %c0_56] : memref<8x24xbf16, #tpu.memory_space<vmem>>, vector<8x24xbf16>
    %c0_57 = arith.constant 0 : index
    %c0_58 = arith.constant 0 : index
    %72 = vector.load %arg7[%c0_57, %c0_58] : memref<8x1xf32, #tpu.memory_space<vmem>>, vector<8x1xf32>
    %c0_59 = arith.constant 0 : index
    %c0_60 = arith.constant 0 : index
    %73 = vector.load %arg8[%c0_59, %c0_60] : memref<8x32xbf16, #tpu.memory_space<vmem>>, vector<8x32xbf16>
    %c0_61 = arith.constant 0 : index
    %c0_62 = arith.constant 0 : index
    %74 = vector.load %arg9[%c0_61, %c0_62] : memref<8x1xf32, #tpu.memory_space<vmem>>, vector<8x1xf32>
    %cst_63 = arith.constant 5.000000e-01 : f32
    %75 = vector.broadcast %cst_63 : f32 to vector<8x128xf32>
    %76 = arith.mulf %75, %70 : vector<8x128xf32>
    %cst_64 = arith.constant 4.471500e-02 : f32
    %77 = vector.broadcast %cst_64 : f32 to vector<8x128xf32>
    %78 = arith.mulf %77, %70 : vector<8x128xf32>
    %79 = arith.mulf %78, %70 : vector<8x128xf32>
    %80 = arith.mulf %79, %70 : vector<8x128xf32>
    %81 = arith.addf %70, %80 : vector<8x128xf32>
    %cst_65 = arith.constant 0.797884583 : f32
    %82 = vector.broadcast %cst_65 : f32 to vector<8x128xf32>
    %83 = arith.mulf %82, %81 : vector<8x128xf32>
    %84 = math.tanh %83 : vector<8x128xf32>
    %cst_66 = arith.constant 1.000000e+00 : f32
    %85 = vector.broadcast %cst_66 : f32 to vector<8x128xf32>
    %86 = arith.addf %85, %84 : vector<8x128xf32>
    %87 = arith.mulf %76, %86 : vector<8x128xf32>
    %cst_67 = arith.constant 0.000000e+00 : f32
    %88 = vector.broadcast %cst_67 : f32 to vector<8x2xf32>
    %c0_68 = arith.constant 0 : index
    %c0_69 = arith.constant 0 : index
    %89 = vector.load %arg11[%c0_68, %c0_69] : memref<32x128xf32, #tpu.memory_space<vmem>>, vector<8x2xf32>
    tpu.vector_store %arg11[%c0_68, %c0_69], %88 {strides = array<i32>} : memref<32x128xf32, #tpu.memory_space<vmem>>, vector<8x2xf32>,
    %90 = vector.extract_strided_slice %87 {offsets = [0, 0], sizes = [8, 16], strides = [1, 1]} : vector<8x128xf32> to vector<8x16xf32>
    %c0_70 = arith.constant 0 : index
    %c2 = arith.constant 2 : index
    %91 = vector.load %arg11[%c0_70, %c2] : memref<32x128xf32, #tpu.memory_space<vmem>>, vector<8x16xf32>
    tpu.vector_store %arg11[%c0_70, %c2], %90 {strides = array<i32>} : memref<32x128xf32, #tpu.memory_space<vmem>>, vector<8x16xf32>,
    %cst_71 = arith.constant 0.000000e+00 : f32
    %92 = vector.broadcast %cst_71 : f32 to vector<8x110xf32>
    %c0_72 = arith.constant 0 : index
    %c18 = arith.constant 18 : index
    %93 = vector.load %arg11[%c0_72, %c18] : memref<32x128xf32, #tpu.memory_space<vmem>>, vector<8x110xf32>
    tpu.vector_store %arg11[%c0_72, %c18], %92 {strides = array<i32>} : memref<32x128xf32, #tpu.memory_space<vmem>>, vector<8x110xf32>,
    %94 = vector.extract_strided_slice %87 {offsets = [0, 0], sizes = [8, 16], strides = [1, 1]} : vector<8x128xf32> to vector<8x16xf32>
    %c8_73 = arith.constant 8 : index
    %c0_74 = arith.constant 0 : index
    %95 = vector.load %arg11[%c8_73, %c0_74] : memref<32x128xf32, #tpu.memory_space<vmem>>, vector<8x16xf32>
    tpu.vector_store %arg11[%c8_73, %c0_74], %94 {strides = array<i32>} : memref<32x128xf32, #tpu.memory_space<vmem>>, vector<8x16xf32>,
    %cst_75 = arith.constant 0.000000e+00 : f32
    %96 = vector.broadcast %cst_75 : f32 to vector<8x112xf32>
    %c8_76 = arith.constant 8 : index
    %c16_77 = arith.constant 16 : index
    %97 = vector.load %arg11[%c8_76, %c16_77] : memref<32x128xf32, #tpu.memory_space<vmem>>, vector<8x112xf32>
    tpu.vector_store %arg11[%c8_76, %c16_77], %96 {strides = array<i32>} : memref<32x128xf32, #tpu.memory_space<vmem>>, vector<8x112xf32>,
    %98 = vector.extract_strided_slice %87 {offsets = [0, 2], sizes = [8, 14], strides = [1, 1]} : vector<8x128xf32> to vector<8x14xf32>
    %c16_78 = arith.constant 16 : index
    %c0_79 = arith.constant 0 : index
    %99 = vector.load %arg11[%c16_78, %c0_79] : memref<32x128xf32, #tpu.memory_space<vmem>>, vector<8x14xf32>
    tpu.vector_store %arg11[%c16_78, %c0_79], %98 {strides = array<i32>} : memref<32x128xf32, #tpu.memory_space<vmem>>, vector<8x14xf32>,
    %cst_80 = arith.constant 0.000000e+00 : f32
    %100 = vector.broadcast %cst_80 : f32 to vector<8x114xf32>
    %c16_81 = arith.constant 16 : index
    %c14 = arith.constant 14 : index
    %101 = vector.load %arg11[%c16_81, %c14] : memref<32x128xf32, #tpu.memory_space<vmem>>, vector<8x114xf32>
    tpu.vector_store %arg11[%c16_81, %c14], %100 {strides = array<i32>} : memref<32x128xf32, #tpu.memory_space<vmem>>, vector<8x114xf32>,
    %c0_82 = arith.constant 0 : index
    %c0_83 = arith.constant 0 : index
    %102 = vector.load %arg11[%c0_82, %c0_83] : memref<32x128xf32, #tpu.memory_space<vmem>>, vector<24x128xf32>
    %103 = arith.truncf %102 : vector<24x128xf32> to vector<24x128xbf16>
    %cst_84 = arith.constant dense<0.000000e+00> : vector<8x128xf32>
    %104 = tpu.matmul %71, %103, %cst_84 {dimension_numbers = #tpu.dot_dimension_numbers<[1], [0], [0], [1], [0, 0, 1, 1], [], []>} : vector<8x24xbf16>, vector<24x128xbf16>, vector<8x128xf32> -> vector<8x128xf32>
    %105 = vector.broadcast %72 : vector<8x1xf32> to vector<8x128xf32>
    %106 = arith.addf %104, %105 : vector<8x128xf32>
    %cst_85 = arith.constant 5.000000e-01 : f32
    %107 = vector.broadcast %cst_85 : f32 to vector<8x128xf32>
    %108 = arith.mulf %107, %106 : vector<8x128xf32>
    %cst_86 = arith.constant 4.471500e-02 : f32
    %109 = vector.broadcast %cst_86 : f32 to vector<8x128xf32>
    %110 = arith.mulf %109, %106 : vector<8x128xf32>
    %111 = arith.mulf %110, %106 : vector<8x128xf32>
    %112 = arith.mulf %111, %106 : vector<8x128xf32>
    %113 = arith.addf %106, %112 : vector<8x128xf32>
    %cst_87 = arith.constant 0.797884583 : f32
    %114 = vector.broadcast %cst_87 : f32 to vector<8x128xf32>
    %115 = arith.mulf %114, %113 : vector<8x128xf32>
    %116 = math.tanh %115 : vector<8x128xf32>
    %cst_88 = arith.constant 1.000000e+00 : f32
    %117 = vector.broadcast %cst_88 : f32 to vector<8x128xf32>
    %118 = arith.addf %117, %116 : vector<8x128xf32>
    %119 = arith.mulf %108, %118 : vector<8x128xf32>
    %cst_89 = arith.constant 0.000000e+00 : f32
    %120 = vector.broadcast %cst_89 : f32 to vector<8x2xf32>
    %c0_90 = arith.constant 0 : index
    %c0_91 = arith.constant 0 : index
    %121 = vector.load %arg11[%c0_90, %c0_91] : memref<32x128xf32, #tpu.memory_space<vmem>>, vector<8x2xf32>
    tpu.vector_store %arg11[%c0_90, %c0_91], %120 {strides = array<i32>} : memref<32x128xf32, #tpu.memory_space<vmem>>, vector<8x2xf32>,
    %122 = vector.extract_strided_slice %119 {offsets = [0, 0], sizes = [8, 16], strides = [1, 1]} : vector<8x128xf32> to vector<8x16xf32>
    %c0_92 = arith.constant 0 : index
    %c2_93 = arith.constant 2 : index
    %123 = vector.load %arg11[%c0_92, %c2_93] : memref<32x128xf32, #tpu.memory_space<vmem>>, vector<8x16xf32>
    tpu.vector_store %arg11[%c0_92, %c2_93], %122 {strides = array<i32>} : memref<32x128xf32, #tpu.memory_space<vmem>>, vector<8x16xf32>,
    %cst_94 = arith.constant 0.000000e+00 : f32
    %124 = vector.broadcast %cst_94 : f32 to vector<8x110xf32>
    %c0_95 = arith.constant 0 : index
    %c18_96 = arith.constant 18 : index
    %125 = vector.load %arg11[%c0_95, %c18_96] : memref<32x128xf32, #tpu.memory_space<vmem>>, vector<8x110xf32>
    tpu.vector_store %arg11[%c0_95, %c18_96], %124 {strides = array<i32>} : memref<32x128xf32, #tpu.memory_space<vmem>>, vector<8x110xf32>,
    %126 = vector.extract_strided_slice %119 {offsets = [0, 0], sizes = [8, 16], strides = [1, 1]} : vector<8x128xf32> to vector<8x16xf32>
    %c8_97 = arith.constant 8 : index
    %c0_98 = arith.constant 0 : index
    %127 = vector.load %arg11[%c8_97, %c0_98] : memref<32x128xf32, #tpu.memory_space<vmem>>, vector<8x16xf32>
    tpu.vector_store %arg11[%c8_97, %c0_98], %126 {strides = array<i32>} : memref<32x128xf32, #tpu.memory_space<vmem>>, vector<8x16xf32>,
    %cst_99 = arith.constant 0.000000e+00 : f32
    %128 = vector.broadcast %cst_99 : f32 to vector<8x112xf32>
    %c8_100 = arith.constant 8 : index
    %c16_101 = arith.constant 16 : index
    %129 = vector.load %arg11[%c8_100, %c16_101] : memref<32x128xf32, #tpu.memory_space<vmem>>, vector<8x112xf32>
    tpu.vector_store %arg11[%c8_100, %c16_101], %128 {strides = array<i32>} : memref<32x128xf32, #tpu.memory_space<vmem>>, vector<8x112xf32>,
    %130 = vector.extract_strided_slice %119 {offsets = [0, 2], sizes = [8, 14], strides = [1, 1]} : vector<8x128xf32> to vector<8x14xf32>
    %c16_102 = arith.constant 16 : index
    %c0_103 = arith.constant 0 : index
    %131 = vector.load %arg11[%c16_102, %c0_103] : memref<32x128xf32, #tpu.memory_space<vmem>>, vector<8x14xf32>
    tpu.vector_store %arg11[%c16_102, %c0_103], %130 {strides = array<i32>} : memref<32x128xf32, #tpu.memory_space<vmem>>, vector<8x14xf32>,
    %cst_104 = arith.constant 0.000000e+00 : f32
    %132 = vector.broadcast %cst_104 : f32 to vector<8x114xf32>
    %c16_105 = arith.constant 16 : index
    %c14_106 = arith.constant 14 : index
    %133 = vector.load %arg11[%c16_105, %c14_106] : memref<32x128xf32, #tpu.memory_space<vmem>>, vector<8x114xf32>
    tpu.vector_store %arg11[%c16_105, %c14_106], %132 {strides = array<i32>} : memref<32x128xf32, #tpu.memory_space<vmem>>, vector<8x114xf32>,
    %c24_107 = arith.constant 24 : index
    %c0_108 = arith.constant 0 : index
    %134 = vector.load %arg11[%c24_107, %c0_108] : memref<32x128xf32, #tpu.memory_space<vmem>>, vector<8x128xf32>
    tpu.vector_store %arg11[%c24_107, %c0_108], %70 {strides = array<i32>} : memref<32x128xf32, #tpu.memory_space<vmem>>, vector<8x128xf32>,
    %c0_109 = arith.constant 0 : index
    %c0_110 = arith.constant 0 : index
    %135 = vector.load %arg11[%c0_109, %c0_110] : memref<32x128xf32, #tpu.memory_space<vmem>>, vector<32x128xf32>
    %136 = arith.truncf %135 : vector<32x128xf32> to vector<32x128xbf16>
    %cst_111 = arith.constant dense<0.000000e+00> : vector<8x128xf32>
    %137 = tpu.matmul %73, %136, %cst_111 {dimension_numbers = #tpu.dot_dimension_numbers<[1], [0], [0], [1], [0, 0, 1, 1], [], []>} : vector<8x32xbf16>, vector<32x128xbf16>, vector<8x128xf32> -> vector<8x128xf32>
    %138 = vector.broadcast %74 : vector<8x1xf32> to vector<8x128xf32>
    %139 = arith.addf %137, %138 : vector<8x128xf32>
    %c0_112 = arith.constant 0 : index
    %c0_113 = arith.constant 0 : index
    %c0_114 = arith.constant 0 : index
    %140 = vector.load %arg10[%c0_112, %c0_113, %c0_114] : memref<1x8x128xf32, #tpu.memory_space<vmem>>, vector<1x8x128xf32>
    %141 = vector.shape_cast %140 : vector<1x8x128xf32> to vector<8x128xf32>
    %142 = vector.shape_cast %139 : vector<8x128xf32> to vector<1x8x128xf32>
    tpu.vector_store %arg10[%c0_112, %c0_113, %c0_114], %142 {strides = array<i32>} : memref<1x8x128xf32, #tpu.memory_space<vmem>>, vector<1x8x128xf32>,
    return
  }
  func.func @transform_0(%arg0: i32) -> (i32, i32, i32) {
    %c0_i32 = arith.constant 0 : i32
    %c0_i32_0 = arith.constant 0 : i32
    %c0_i32_1 = arith.constant 0 : i32
    return %arg0, %c0_i32, %c0_i32_0 : i32, i32, i32
  }
  func.func @transform_1(%arg0: i32) -> (i32, i32) {
    %c0_i32 = arith.constant 0 : i32
    %c0_i32_0 = arith.constant 0 : i32
    %c0_i32_1 = arith.constant 0 : i32
    return %c0_i32, %c0_i32_0 : i32, i32
  }
  func.func @transform_2(%arg0: i32) -> (i32, i32) {
    %c0_i32 = arith.constant 0 : i32
    %c0_i32_0 = arith.constant 0 : i32
    %c0_i32_1 = arith.constant 0 : i32
    return %c0_i32, %c0_i32_0 : i32, i32
  }
  func.func @transform_3(%arg0: i32) -> (i32, i32) {
    %c0_i32 = arith.constant 0 : i32
    %c0_i32_0 = arith.constant 0 : i32
    %c0_i32_1 = arith.constant 0 : i32
    return %c0_i32, %c0_i32_0 : i32, i32
  }
  func.func @transform_4(%arg0: i32) -> (i32, i32) {
    %c0_i32 = arith.constant 0 : i32
    %c0_i32_0 = arith.constant 0 : i32
    %c0_i32_1 = arith.constant 0 : i32
    return %c0_i32, %c0_i32_0 : i32, i32
  }
  func.func @transform_5(%arg0: i32) -> (i32, i32) {
    %c0_i32 = arith.constant 0 : i32
    %c0_i32_0 = arith.constant 0 : i32
    %c0_i32_1 = arith.constant 0 : i32
    return %c0_i32, %c0_i32_0 : i32, i32
  }
  func.func @transform_6(%arg0: i32) -> (i32, i32) {
    %c0_i32 = arith.constant 0 : i32
    %c0_i32_0 = arith.constant 0 : i32
    %c0_i32_1 = arith.constant 0 : i32
    return %c0_i32, %c0_i32_0 : i32, i32
  }
  func.func @transform_7(%arg0: i32) -> (i32, i32) {
    %c0_i32 = arith.constant 0 : i32
    %c0_i32_0 = arith.constant 0 : i32
    %c0_i32_1 = arith.constant 0 : i32
    return %c0_i32, %c0_i32_0 : i32, i32
  }
  func.func @transform_8(%arg0: i32) -> (i32, i32) {
    %c0_i32 = arith.constant 0 : i32
    %c0_i32_0 = arith.constant 0 : i32
    %c0_i32_1 = arith.constant 0 : i32
    return %c0_i32, %c0_i32_0 : i32, i32
  }
  func.func @transform_9(%arg0: i32) -> (i32, i32, i32) {
    %c0_i32 = arith.constant 0 : i32
    %c0_i32_0 = arith.constant 0 : i32
    %c0_i32_1 = arith.constant 0 : i32
    return %arg0, %c0_i32, %c0_i32_0 : i32, i32, i32
  }
}

</mosaic_0001>

<bundles_post_ra>
// kernel: tpu_custom_call.1
= control target key start
LH: loop header
LB: loop body
LE: loop exit
PB: predicated region body
PF: predicated region fallthrough
CT: control target
= control target key end

     0   :  { %14 = vsyncpa [#allocation4], 0  ;;  %s1191_s0 = inlined_call_operand.vmem [shape: f32[2,8,128], index: 0, kind: input, shape index: {}]   ;;  %s1192_s1 = inlined_call_operand.vmem [shape: bf16[8,24], index: 1, kind: input, shape index: {}]   ;;  %s1193_s2 = inlined_call_operand.vmem [shape: f32[8,1], index: 2, kind: input, shape index: {}]   ;;  %s1194_s3 = inlined_call_operand.vmem [shape: bf16[8,32], index: 3, kind: input, shape index: {}]   ;;  %s1195_s4 = inlined_call_operand.vmem [shape: f32[8,1], index: 4, kind: input, shape index: {}]   ;;  %s1196_s5 = inlined_call_operand.vmem [shape: bf16[8,24], index: 5, kind: input, shape index: {}]   ;;  %s1197_s6 = inlined_call_operand.vmem [shape: f32[8,1], index: 6, kind: input, shape index: {}]   ;;  %s1198_s7 = inlined_call_operand.vmem [shape: bf16[8,32], index: 7, kind: input, shape index: {}]   ;;  %s1199_s8 = inlined_call_operand.vmem [shape: f32[8,1], index: 8, kind: input, shape index: {}]   ;;  %s1200_s9 = inlined_call_operand.hbm [shape: f32[2,8,128], index: 9, kind: output, shape index: {}]  }
   0x1   :  { %16 = vsyncpa [#allocation4 + $0x1], 0  ;;  %s977_s30 = smov 0   ;;  %s979_s10 = smov 0  }
   0x2   :  { %s981_s11 = smov 0   ;;  %s983_s12 = smov 0  }
   0x3 LB: > { %s998_s13 = sadd.s32 4294967295, %s917_s12   ;;  %s741_s14 = sadd.s32 4294967294, %s917_s12   ;;  %s917_s12 = sphi %s983_s12, %s1206_s12   ;;  %s913_s11 = sphi %s981_s11, %s1205_s11   ;;  %s909_s10 = sphi %s979_s10, %s1204_s10   ;;  %s905_s30 = sphi %s977_s30, %s1203_s30  }
   0x4   : > { %s1002_s15 = sadd.s32 1, %s917_s12   ;;  %s223_s16 = sadd.s32 1, %s913_s11 }
   0x5   : > { %s220_s17 = ssub.s32 %s917_s12, %s1002_s15  ;;  %p233_p0 = scmp.ne.s32.totalorder %s913_s11, %s909_s10 }
   0x6   : > { %p221_p1 = scmp.eq.s32.totalorder %s220_s17, 0  ;;  %p234_p2 = scmp.eq.s32.totalorder %s998_s13, 1 }
   0x7   : > { %p239_p3 = scmp.ne.s32.totalorder %s909_s10, %s905_s30  ;;  %p240_p4 = scmp.eq.s32.totalorder %s741_s14, 1 }
   0x8   : > { %s1013_s18 = scalar_select %p221_p1, %s913_s11, %s223_s16  }
   0x9   : > { %p1015_p5 = por %p234_p2, %p233_p0  ;;  %p1019_p6 = por %p240_p4, %p239_p3 }
   0xa   : > { %p744_p7 = scmp.ge.s32.totalorder %s917_s12, 1  ;;  %p289_p8 = scmp.lt.s32.totalorder %s917_s12, 3 }
   0xc   : > { %p290_p9 = pnand %p744_p7, %p289_p8 }
   0xd   : > { %p324_p10 = scmp.lt.s32.totalorder (!%p290_p9), %s998_s13, 1  ;;  %vm343_vm0 = vcmask (!%p290_p9), 7168   ;;  %v919_v0 = vmov (!%p290_p9), 0.0   ;;  %vm353_vm1 = vcmask (!%p290_p9), 130048   ;;  %vm355_vm2 = vcmask (!%p290_p9), 1047680   ;;  %s920_s26 = smov (!%p290_p9), 1  }
   0xe   : > { %293 = sbr.rel (%p290_p9) target bundleno = 1533 (0x5fd), region = 56  ;;  %344 = vst.msk [vmem:[#allocation2] sm:$0xff] (!%p290_p9), %vm343_vm0, %v919_v0  ;;  %767 = vmatprep.subr.bf16.mxu0 (!%p290_p9), %v919_v0  ;;  %775 = vmatprep.subr.bf16.mxu1 (!%p290_p9), %v919_v0  ;;  %s921_s27 = smov (!%p290_p9), 127   ;;  %vm922_vm3 = vmmov (!%p290_p9), 0   ;;  %v331_v11 = vld [vmem:[%s1193_s2] sm:$0xff] (!%p290_p9)  ;;  %v923_v12 = vmov (!%p290_p9), 0  }
   0xf   : > { %771 = vmatprep.mubr.msk.bf16.mxu0 (!%p290_p9), %vm922_vm3, %v919_v0  ;;  %779 = vmatprep.mubr.msk.bf16.mxu1 (!%p290_p9), %vm922_vm3, %v919_v0  ;;  %vm349_vm4 = vcmask (!%p290_p9), 138248   ;;  %vm351_vm5 = vcmask (!%p290_p9), 1047688   ;;  %vm360_vm6 = vcmask (!%p290_p9), 121856   ;;  %vm362_vm7 = vcmask (!%p290_p9), 1047672   ;;  %v330_v21 = vld [vmem:[%s1192_s1] sm:$0xf] (!%p290_p9) }
  0x10   : > { %845 = vset.pattern.permute.xlu1 (!%p290_p9), %v923_v12  ;;  %846 = vset.pattern.permute.xlu0 (!%p290_p9), %v923_v12  ;;  %vm378_vm8 = vcmask (!%p290_p9), 1043456   ;;  %vm374_vm9 = vcmask (!%p290_p9), 195584   ;;  %v333_v37 = vld [vmem:[%s1195_s4] sm:$0xff] (!%p290_p9)  ;;  %vm457_vm10 = vcmask (!%p290_p9), 261120   ;;  %vm514_vm11 = vcmask (!%p290_p9), 15360   ;;  %s924_s24 = smov (!%p290_p9), 126  }
  0x11   : > { %371 = vperm.xlu1 (!%p290_p9), %845, %v331_v11   ;;  %v332_v45 = vld [vmem:[%s1194_s3] sm:$0xf] (!%p290_p9)  ;;  %vm529_vm12 = vcmask (!%p290_p9), 113664   ;;  %vm520_vm13 = vcmask (!%p290_p9), 146448   ;;  %vm531_vm14 = vcmask (!%p290_p9), 1047664   ;;  %vm522_vm15 = vcmask (!%p290_p9), 1047696  }
  0x12   : > { %v502_v61 = vld [vmem:[%s1197_s6] sm:$0xff] (!%p290_p9)  ;;  %s926_s16 = smov (!%p290_p9), [#allocation3]  }
  0x13   : > { %v504_v62 = vld [vmem:[%s1199_s8] sm:$0xff] (!%p290_p9)  ;;  %s859_s17 = sshll.u32 (!%p290_p9), %s926_s16, 4  ;;  %s860_s17 = int_to_ptr.vmem [resolvable:$false] %s859_s17 }
  0x15   : > { %s325_s21 = scalar_select %p324_p10, %s998_s13, 1 }
  0x17   : > { %s746_s22 = sshll.u32 %s325_s21, 3  ;;  %s861_s21 = scalar_lea.vmem %s860_s17, 256 }
  0x18   : > { %s327_s25 = scalar_lea.vmem %s1191_s0, %s746_s22  ;;  %s321_s22 = sand.u32 1, %s909_s10  }
  0x19   : > { %v1034_v1 = vld [vmem:[%s327_s25] sm:$0xff]  ;;  %s925_s25 = smov 2   ;;  %s745_s23 = sshll.u32 %s321_s22, 3 }
  0x1a   : > { %v335_v2 = vmul.f32 0.044715, %v1034_v1  ;;  %v334_v7 = vmul.f32 0.5, %v1034_v1 }
  0x1c   : > { %v336_v3 = vmul.f32 %v335_v2, %v1034_v1 }
  0x1e   : > { %v337_v4 = vmul.f32 %v336_v3, %v1034_v1 }
  0x20   : > { %v338_v5 = vadd.f32 %v337_v4, %v1034_v1 }
  0x22   : > { %v339_v6 = vmul.f32 0.7978846, %v338_v5 }
  0x24   : > { %847 = vtanh.f32 %v339_v6 }
  0x2e   : > { %v848_v8 = vpop.eup %847 }
  0x2f   : > { %v341_v9 = vadd.f32 1.0, %v848_v8  ;;  %v501_v8 = vld [vmem:[%s1196_s5] sm:$0xf] }
  0x31   : > { %v342_v10 = vmul.f32 %v341_v9, %v334_v7 }
  0x33   : > { %346 = vrot.lane.b32.xlu0 %v342_v10, %s920_s26  ;;  %354 = vst.msk [vmem:[#allocation2 + $0x8] sm:$0xff] %vm353_vm1, %v342_v10 }
  0x34   : > { %356 = vst.msk [vmem:[#allocation2 + $0x8] sm:$0xff] %vm355_vm2, %v919_v0 }
  0x37   : > { %357 = vrot.lane.b32.xlu0 %v342_v10, %s921_s27 }
  0x3b   : > { %v365_v15 = vld [vmem:[#allocation2 + $0x8] sm:$0xff] }
  0x90   : > { %v372_v22 = vpop.permute.xlu1 %371 }
  0xa5   : > { %v347_v13 = vpop.permute.xlu0 %346 }
  0xa6   : > { %350 = vst.msk [vmem:[#allocation2] sm:$0xff] %vm349_vm4, %v347_v13 }
  0xa7   : > { %352 = vst.msk [vmem:[#allocation2] sm:$0xff] %vm351_vm5, %v919_v0 }
  0xa9   : > { %v358_v14 = vpop.permute.xlu0 %357 }
  0xaa   : > { %361 = vst.msk [vmem:[#allocation2 + $0x10] sm:$0xff] %vm360_vm6, %v358_v14 }
  0xab   : > { %363 = vst.msk [vmem:[#allocation2 + $0x10] sm:$0xff] %vm362_vm7, %v919_v0 }
  0xae   : > { %v364_v16 = vld [vmem:[#allocation2] sm:$0xff] }
  0xaf   : > { %v367_v17 = vpack.c.bf16 %v365_v15, %v364_v16  ;;  %431 = vst.msk [vmem:[#allocation2] sm:$0xff] %vm343_vm0, %v919_v0 }
  0xb1   : > { %768 = vmatpush3.bf16.msra.mxu0 %v367_v17 }
  0xb2   : > { %769 = vmatprep.subr.bf16.mxu0 %v919_v0  ;;  %v366_v18 = vld [vmem:[#allocation2 + $0x10] sm:$0xff] }
  0xb3   : > { %v368_v19 = vpack.c.bf16 %v366_v18, %v366_v18 }
  0xb5   : > { %v380_v20 = vsel %vm378_vm8, %v368_v19, 0 }
  0xb6   : > { %770 = vmatpush3.bf16.msra.mxu0 %v380_v20 }
  0xb7   : > { %783 = vmatprep.subr.bf16.mxu0 %v919_v0 }
  0xb9   : > { %772 = vmatmul.mubr.msk.bf16.vlgmr.msra.gmra.mrb[0].mxu0 %vm374_vm9, %v330_v21 }
  0xba   : > { %787 = vmatprep.mubr.msk.bf16.mxu0 %vm922_vm3, %v919_v0 }
 0x18c   : > { %v416_v23 = vpop.f32.mrb[0].mxu0 }
 0x18d   : > { %v417_v24 = vadd.f32 %v416_v23, %v372_v22  ;;  %v773_v25 = vpop.f32.mrb[1].mxu0 }
 0x18e   : > { %v419_v26 = vpop.f32.mrb[2].mxu0 }
 0x18f   : > { %v423_v27 = vmul.f32 0.044715, %v417_v24  ;;  %v774_v28 = vpop.f32.mrb[3].mxu0  ;;  %v422_v34 = vmul.f32 0.5, %v417_v24 }
 0x191   : > { %v424_v29 = vmul.f32 %v423_v27, %v417_v24 }
 0x193   : > { %v425_v30 = vmul.f32 %v424_v29, %v417_v24 }
 0x195   : > { %v426_v31 = vadd.f32 %v425_v30, %v417_v24 }
 0x197   : > { %v427_v32 = vmul.f32 0.7978846, %v426_v31  ;;  %v503_v31 = vld [vmem:[%s1198_s7] sm:$0xf] }
 0x199   : > { %849 = vtanh.f32 %v427_v32 }
 0x1a3   : > { %v850_v33 = vpop.eup %849 }
 0x1a4   : > { %v429_v35 = vadd.f32 1.0, %v850_v33 }
 0x1a6   : > { %v430_v36 = vmul.f32 %v429_v35, %v422_v34 }
 0x1a8   : > { %440 = vrot.lane.b32.xlu0 %v430_v36, %s921_s27  ;;  %438 = vst.msk [vmem:[#allocation2 + $0x8] sm:$0xff] %vm353_vm1, %v430_v36  ;;  %433 = vrot.lane.b32.xlu1 %v430_v36, %s920_s26 }
 0x1a9   : > { %439 = vst.msk [vmem:[#allocation2 + $0x8] sm:$0xff] %vm355_vm2, %v919_v0 }
 0x1ac   : > { %454 = vperm.xlu1 %845, %v333_v37  }
 0x1b0   : > { %v447_v40 = vld [vmem:[#allocation2 + $0x8] sm:$0xff] }
 0x21a   : > { %v441_v38 = vpop.permute.xlu0 %440  ;;  %v434_v39 = vpop.permute.xlu1 %433 }
 0x21b   : > { %443 = vst.msk [vmem:[#allocation2 + $0x10] sm:$0xff] %vm360_vm6, %v441_v38 }
 0x21c   : > { %436 = vst.msk [vmem:[#allocation2] sm:$0xff] %vm349_vm4, %v434_v39 }
 0x21d   : > { %444 = vst.msk [vmem:[#allocation2 + $0x10] sm:$0xff] %vm362_vm7, %v919_v0 }
 0x21e   : > { %437 = vst.msk [vmem:[#allocation2] sm:$0xff] %vm351_vm5, %v919_v0 }
 0x224   : > { %v448_v42 = vld [vmem:[#allocation2 + $0x10] sm:$0xff] }
 0x225   : > { %v446_v41 = vld [vmem:[#allocation2] sm:$0xff]  ;;  %v451_v44 = vpack.c.bf16 %v1034_v1, %v448_v42 }
 0x226   : > { %v450_v43 = vpack.c.bf16 %v447_v40, %v446_v41  ;;  %515 = vst.msk [vmem:[#allocation2] sm:$0xff] %vm514_vm11, %v919_v0 }
 0x228   : > { %776 = vmatpush3.bf16.msra.mxu1 %v450_v43 }
 0x229   : > { %777 = vmatprep.subr.bf16.mxu1 %v919_v0 }
 0x22b   : > { %v455_v46 = vpop.permute.xlu1 %454 }
 0x22c   : > { %778 = vmatpush3.bf16.msra.mxu1 %v451_v44 }
 0x22d   : > { %791 = vmatprep.subr.bf16.mxu1 %v919_v0 }
 0x22f   : > { %780 = vmatmul.mubr.msk.bf16.vlgmr.msra.gmra.mrb[0].mxu1 %vm457_vm10, %v332_v45 }
 0x230   : > { %795 = vmatprep.mubr.msk.bf16.mxu1 %vm922_vm3, %v919_v0 }
 0x302   : > { %v495_v47 = vpop.f32.mrb[0].mxu1 }
 0x303   : > { %v1093_v48 = vadd.f32 %v495_v47, %v455_v46  ;;  %v781_v49 = vpop.f32.mrb[1].mxu1 }
 0x304   : > { %v498_v50 = vpop.f32.mrb[2].mxu1 }
 0x305   : > { %v782_v51 = vpop.f32.mrb[3].mxu1  ;;  %v506_v52 = vmul.f32 0.044715, %v1093_v48  ;;  %v505_v58 = vmul.f32 0.5, %v1093_v48 }
 0x307   : > { %v507_v53 = vmul.f32 %v506_v52, %v1093_v48 }
 0x309   : > { %v508_v54 = vmul.f32 %v507_v53, %v1093_v48 }
 0x30b   : > { %v509_v55 = vadd.f32 %v508_v54, %v1093_v48 }
 0x30d   : > { %v510_v56 = vmul.f32 0.7978846, %v509_v55 }
 0x30f   : > { %851 = vtanh.f32 %v510_v56 }
 0x319   : > { %v852_v57 = vpop.eup %851 }
 0x31a   : > { %v512_v59 = vadd.f32 1.0, %v852_v57 }
 0x31c   : > { %v513_v60 = vmul.f32 %v512_v59, %v505_v58 }
 0x31e   : > { %526 = vrot.lane.b32.xlu1 %v513_v60, %s924_s24  ;;  %524 = vst.msk [vmem:[#allocation2 + $0x8] sm:$0xff] %vm353_vm1, %v513_v60  ;;  %517 = vrot.lane.b32.xlu0 %v513_v60, %s925_s25 }
 0x31f   : > { %525 = vst.msk [vmem:[#allocation2 + $0x8] sm:$0xff] %vm355_vm2, %v919_v0 }
 0x322   : > { %540 = vperm.xlu0 %846, %v502_v61  }
 0x326   : > { %621 = vperm.xlu0 %846, %v504_v62   ;;  %v534_v2 = vld [vmem:[#allocation2 + $0x8] sm:$0xff] }
 0x390   : > { %v527_v63 = vpop.permute.xlu1 %526  ;;  %v518_v1 = vpop.permute.xlu0 %517 }
 0x391   : > { %530 = vst.msk [vmem:[#allocation2 + $0x10] sm:$0xff] %vm529_vm12, %v527_v63 }
 0x392   : > { %521 = vst.msk [vmem:[#allocation2] sm:$0xff] %vm520_vm13, %v518_v1 }
 0x393   : > { %532 = vst.msk [vmem:[#allocation2 + $0x10] sm:$0xff] %vm531_vm14, %v919_v0 }
 0x394   : > { %523 = vst.msk [vmem:[#allocation2] sm:$0xff] %vm522_vm15, %v919_v0 }
 0x39a   : > { %v535_v4 = vld [vmem:[#allocation2 + $0x10] sm:$0xff] }
 0x39b   : > { %v533_v3 = vld [vmem:[#allocation2] sm:$0xff]  ;;  %v537_v6 = vpack.c.bf16 %v535_v4, %v535_v4 }
 0x39c   : > { %v536_v5 = vpack.c.bf16 %v534_v2, %v533_v3  ;;  %598 = vst.msk [vmem:[#allocation2] sm:$0xff] %vm514_vm11, %v919_v0 }
 0x39d   : > { %v547_v7 = vsel %vm378_vm8, %v537_v6, 0 }
 0x39e   : > { %784 = vmatpush3.bf16.msra.mxu0 %v536_v5 }
 0x39f   : > { %785 = vmatprep.subr.bf16.mxu0 %v919_v0 }
 0x3a1   : > { %v541_v9 = vpop.permute.xlu0 %540 }
 0x3a2   : > { %786 = vmatpush3.bf16.msra.mxu0 %v547_v7 }
 0x3a5   : > { %788 = vmatmul.mubr.msk.bf16.vlgmr.msra.gmra.mrb[4].mxu0 %vm374_vm9, %v501_v8  ;;  %v622_v32 = vpop.permute.xlu0 %621 }
 0x478   : > { %v583_v10 = vpop.f32.mrb[4].mxu0 }
 0x479   : > { %v584_v11 = vadd.f32 %v583_v10, %v541_v9  ;;  %v789_v12 = vpop.f32.mrb[5].mxu0 }
 0x47a   : > { %v586_v13 = vpop.f32.mrb[6].mxu0 }
 0x47b   : > { %v590_v14 = vmul.f32 0.044715, %v584_v11  ;;  %v790_v15 = vpop.f32.mrb[7].mxu0  ;;  %v589_v21 = vmul.f32 0.5, %v584_v11 }
 0x47d   : > { %v591_v16 = vmul.f32 %v590_v14, %v584_v11 }
 0x47f   : > { %v592_v17 = vmul.f32 %v591_v16, %v584_v11 }
 0x481   : > { %v593_v18 = vadd.f32 %v592_v17, %v584_v11 }
 0x483   : > { %v594_v19 = vmul.f32 0.7978846, %v593_v18 }
 0x485   : > { %853 = vtanh.f32 %v594_v19 }
 0x48f   : > { %v854_v20 = vpop.eup %853 }
 0x490   : > { %v596_v22 = vadd.f32 1.0, %v854_v20 }
 0x492   : > { %v597_v23 = vmul.f32 %v596_v22, %v589_v21 }
 0x494   : > { %600 = vrot.lane.b32.xlu1 %v597_v23, %s925_s25  ;;  %605 = vst.msk [vmem:[#allocation2 + $0x8] sm:$0xff] %vm353_vm1, %v597_v23  ;;  %s323_s25 = scalar_lea.vmem [#allocation3], %s745_s23 }
 0x495   : > { %606 = vst.msk [vmem:[#allocation2 + $0x8] sm:$0xff] %vm355_vm2, %v919_v0  ;;  %s682_s26 = sshll.u32 %s323_s25, 4  ;;  %s1151_s26 = int_to_ptr.vmem [resolvable:$true] %s682_s26 }
 0x496   : > { %s855_s14 = scalar_lea.vmem %s1151_s26, 128  ;;  %p862_p0 = scmp.lt.s32.totalorder %s1151_s26, %s860_s17 }
 0x497   : > { %p856_p11 = scmp.ne.s32.totalorder %s1151_s26, %s855_s14  ;;  %p863_p1 = scmp.lt.s32.totalorder %s861_s21, %s855_s14 }
 0x498   : > { %607 = vrot.lane.b32.xlu1 %v597_v23, %s924_s24  ;;  %s752_s24 = sshll.u32 %s998_s13, 7  ;;  %s669_s13 = scalar_lea.sflag [#allocation4], %s321_s22 }
 0x499   : > { %s1149_s29 = scalar_lea.hbm %s1200_s9, %s752_s24  ;;  %p857_p12 = pnand %p856_p11, %p1015_p5 }
 0x49a   : > { %p864_p2 = por %p863_p1, %p862_p0 }
 0x49b   : > { %p858_p13 = pneg %p857_p12 }
 0x49c   : > { %v614_v26 = vld [vmem:[#allocation2 + $0x8] sm:$0xff] }
 0x49d   : > { %p865_p3 = pnand %p864_p2, %p858_p13 }
 0x506   : > { %v601_v24 = vpop.permute.xlu1 %600 }
 0x507   : > { %603 = vst.msk [vmem:[#allocation2] sm:$0xff] %vm520_vm13, %v601_v24 }
 0x508   : > { %604 = vst.msk [vmem:[#allocation2] sm:$0xff] %vm522_vm15, %v919_v0 }
 0x50a   : > { %v608_v25 = vpop.permute.xlu1 %607 }
 0x50b   : > { %610 = vst.msk [vmem:[#allocation2 + $0x10] sm:$0xff] %vm529_vm12, %v608_v25 }
 0x50c   : > { %611 = vst.msk [vmem:[#allocation2 + $0x10] sm:$0xff] %vm531_vm14, %v919_v0 }
 0x50f   : > { %v613_v27 = vld [vmem:[#allocation2] sm:$0xff] }
 0x510   : > { %v617_v28 = vpack.c.bf16 %v614_v26, %v613_v27 }
 0x512   : > { %792 = vmatpush3.bf16.msra.mxu1 %v617_v28 }
 0x513   : > { %793 = vmatprep.subr.bf16.mxu1 %v919_v0  ;;  %v615_v29 = vld [vmem:[#allocation2 + $0x10] sm:$0xff] }
 0x514   : > { %v618_v30 = vpack.c.bf16 %v1093_v48, %v615_v29 }
 0x516   : > { %794 = vmatpush3.bf16.msra.mxu1 %v618_v30 }
 0x519   : > { %796 = vmatmul.mubr.msk.bf16.vlgmr.msra.gmra.mrb[4].mxu1 %vm457_vm10, %v503_v31 }
 0x5ec   : > { %v661_v33 = vpop.f32.mrb[4].mxu1 }
 0x5ed   : > { %v662_v34 = vadd.f32 %v661_v33, %v622_v32  ;;  %v797_v0 = vpop.f32.mrb[5].mxu1 }
 0x5ee   : > { %v664_v35 = vpop.f32.mrb[6].mxu1 }
 0x5ef   : > { %667 = vst [vmem:[%s323_s25] sm:$0xff] %v662_v34  ;;  %v798_v36 = vpop.f32.mrb[7].mxu1 }
 0x5f0   : > { %868 = shalt.err (!%p865_p3)
}
 0x5f1   : > { %s869_s22 = scalar_lea.hbm %s1149_s29, 128  ;;  %s873_s25 = scalar_lea.hbm %s1200_s9, 256 }
 0x5f2   : > { %p870_p4 = scmp.ne.s32.totalorder %s1149_s29, %s869_s22  ;;  %p874_p9 = scmp.lt.u32.totalorder %s1149_s29, %s1200_s9 }
 0x5f3   : > { %p875_p10 = scmp.lt.u32.totalorder %s873_s25, %s869_s22  ;;  %p877_p12 = scmp.lt.u32.totalorder %s869_s22, %s1149_s29 }
 0x5f4   : > { %p871_p7 = pnand %p870_p4, %p1015_p5 }
 0x5f5   : > { %p876_p11 = por %p875_p10, %p874_p9 }
 0x5f6   : > { %p872_p8 = pneg %p871_p7 }
 0x5f7   : > { %p878_p13 = por %p877_p12, %p876_p11 }
 0x5f9   : > { %p879_p0 = pnand %p878_p13, %p872_p8 }
 0x5fb   : > { %882 = shalt.err (!%p879_p0)
}
 0x5fc   : > { %799 = dma.vmem_to_hbm [thread:$0]  (%p1015_p5), %s1151_s26, 128, %s1149_s29, %s669_s13  }
 0x5fd PF: > { %p805_p1 = scmp.ge.s32.totalorder %s917_s12, 2  ;;  %s694_s14 = sand.u32 1, %s905_s30  }
 0x5fe   : > { %s695_s16 = scalar_lea.sflag [#allocation4], %s694_s14 }
 0x5ff   : > { %p802_p2 = pnand %p805_p1, %p1019_p6 }
 0x601   : > { %900 = dma.done.wait (!%p802_p2), %s695_s16, 128  }
 0x602   : > { %902 = vsyncadd (!%p802_p2), %s695_s16, 4294967168  ;;  %p19_p3 = scmp.ge.s32.totalorder %s1002_s15, 4   ;;  %s1203_s30 = smov %s909_s10 }
 0x603   : > { %s1204_s10 = smov %s913_s11  ;;  %s1205_s11 = smov %s1013_s18 }
 0x604   : > { %s1206_s12 = smov %s1002_s15  ;;  %21 = sbr.rel (!%p19_p3) target bundleno = 3 (0x3), region = 91 }
 0x60b   :  { %700 = vsyncpa [#allocation4], 1 }
 0x60c   :  { %702 = vsyncpa [#allocation4 + $0x1], 1 }

</bundles_post_ra>
